<compile_context>
chip_gen: v6e
topology: v6e:2x2x1
jax: 0.10.0
libtpu: 0.0.40
codegen_flags: <defaults>
</compile_context>

<pallas_src>
import math
import functools

import jax
import jax.numpy as jnp
from jax.experimental import pallas as pl
from jax.experimental.pallas import tpu as pltpu


_NEG_INF = -1e30  # finite large-negative mask fill; masking happens in f32


def _pick_tile(n, candidates):
    """Largest candidate tile that evenly divides n, else the full extent."""
    for c in candidates:
        if n % c == 0:
            return c
    return n


def _device_kind():
    try:
        return jax.devices()[0].device_kind.lower()
    except Exception:
        return ""


def _is_v5e(kind):
    return ("v5" in kind) and ("lite" in kind or "5e" in kind)


def _vmem_limit_bytes():
    # Raise the scoped-VMEM limit above the 16/32 MiB defaults, with headroom
    # below physical capacity (128 MiB on v5e/v6e, 64 MiB on v7x).
    try:
        cap = int(pltpu.get_tpu_info().vmem_capacity_bytes)
    except Exception:
        cap = 64 * 1024 * 1024
    return max(32 * 1024 * 1024,
               min(cap - 16 * 1024 * 1024, 100 * 1024 * 1024))


def _default_attn_tiles(T, kind):
    # v5e: 128-wide MXU, no bf16 VPU/EUP -> 128x128.
    # v7x: 64 MiB VMEM -> keep the f32 (H,tq,tk) intermediates slim: 128x256.
    # v6e (and default): 256x256.
    if _is_v5e(kind):
        q_cands, k_cands = (128,), (128,)
    elif "v7" in kind:
        q_cands, k_cands = (128,), (256, 128)
    else:
        q_cands, k_cands = (256, 128), (256, 128)
    return _pick_tile(T, q_cands), _pick_tile(T, k_cands)


# ---------------------------------------------------------------------------
# Kernel A: fused QKV projection (row-tiled GEMM, weights VMEM-resident)
# ---------------------------------------------------------------------------
def _qkv_proj_kernel(x_ref, w_ref, b_ref, o_ref):
    acc = jnp.dot(x_ref[...], w_ref[...], preferred_element_type=jnp.float32)
    o_ref[...] = (acc + b_ref[...]).astype(o_ref.dtype)


# ---------------------------------------------------------------------------
# Kernel B: flash-style causal attention with fused output projection
# ---------------------------------------------------------------------------
def _flash_attn_kernel(q_ref, k_ref, v_ref, wp_ref, bp_ref, o_ref,
                       m_sc, l_sc, acc_sc, *, n_head, scale, exp_in_bf16):
    tq = q_ref.shape[2]
    tk = k_ref.shape[2]
    qi = pl.program_id(1)
    kv = pl.program_id(2)
    num_kv = pl.num_programs(2)

    # ---- reset online-softmax state at the start of every key loop ----------
    @pl.when(kv == 0)
    def _():
        m_sc[...] = jnp.full(m_sc.shape, -jnp.inf, m_sc.dtype)
        l_sc[...] = jnp.zeros(l_sc.shape, l_sc.dtype)
        acc_sc[...] = jnp.zeros(acc_sc.shape, acc_sc.dtype)

    q_start = qi * tq
    kv_start = kv * tk

    # ---- skip key tiles entirely above the causal diagonal ------------------
    # (their DMA is also elided by the clamped index_map in the wrapper)
    @pl.when(kv_start <= q_start + (tq - 1))
    def _():
        q = q_ref[0] * scale               # fold 1/sqrt(D) into q (H*tq*D muls)
        k = k_ref[0]                       # (H, tk, D)
        v = v_ref[0]                       # (H, tk, D)

        # head-batched QK^T on the MXU; k consumed in stored layout (no .T)
        s = jnp.einsum("hqd,hkd->hqk", q, k,
                       preferred_element_type=jnp.float32)        # f32

        def _apply_causal_mask(t):
            row = q_start + jax.lax.broadcasted_iota(jnp.int32, (tq, tk), 0)
            col = kv_start + jax.lax.broadcasted_iota(jnp.int32, (tq, tk), 1)
            return jnp.where((col <= row)[None, :, :], t, _NEG_INF)

        # Mask only diagonal-straddling tiles; interior (fully below-diagonal)
        # tiles skip the H*tq*tk compare+select work entirely.
        s = jax.lax.cond(kv_start + (tk - 1) <= q_start,
                         lambda t: t, _apply_causal_mask, s)

        m_prev = m_sc[...]                                        # (H, tq, 1)
        m_new = jnp.maximum(m_prev, jnp.max(s, axis=-1, keepdims=True))
        alpha = jnp.exp(m_prev - m_new)

        if exp_in_bf16:
            # bf16 EUP path (v6e/v7x, bf16 activations only); l-sum stays f32.
            p = jnp.exp((s - m_new).astype(jnp.bfloat16))
            p_sum = jnp.sum(p.astype(jnp.float32), axis=-1, keepdims=True)
        else:
            p = jnp.exp(s - m_new)                                # (H, tq, tk)
            p_sum = jnp.sum(p, axis=-1, keepdims=True)

        l_sc[...] = alpha * l_sc[...] + p_sum
        acc_sc[...] = alpha * acc_sc[...] + jnp.einsum(
            "hqk,hkd->hqd", p.astype(v.dtype), v,
            preferred_element_type=jnp.float32)                   # (H, tq, D)
        m_sc[...] = m_new

    # ---- epilogue: normalize + fused c_proj, written once per (b, q-tile) ---
    @pl.when(kv == num_kv - 1)
    def _():
        inv_l = 1.0 / l_sc[...]            # exact f32 normalization
        attn = acc_sc[...] * inv_l         # (H, tq, D) f32
        C = o_ref.shape[2]
        # concat_h(attn_h) @ W_proj  ==  sum_h attn_h @ W_proj[h*D:(h+1)*D, :]
        # TODO(synk): replace with a single (tq,H*D)@(H*D,C) MXU pass once a
        # Mosaic-safe head-merge relayout is available (per-head K=D underfills
        # the 256-deep MXU on v6e/v7x).
        y = jnp.zeros((tq, C), jnp.float32)
        for h in range(n_head):
            y = y + jnp.dot(attn[h].astype(wp_ref.dtype), wp_ref[h],
                            preferred_element_type=jnp.float32)
        y = y + bp_ref[...]
        o_ref[0] = y.astype(o_ref.dtype)


# ---------------------------------------------------------------------------
# Wrapper
# ---------------------------------------------------------------------------
def causal_self_attention(x, params, n_head, *, tq=None, tk=None):
    """y = c_proj( causal_softmax(QK^T / sqrt(D)) V ),  Q,K,V = c_attn(x)."""
    B, T, C = x.shape
    assert C % n_head == 0
    D = C // n_head
    M = B * T

    w_qkv, b_qkv = params["w_qkv"], params["b_qkv"]      # (C, 3C), (1, 3C)
    w_proj, b_proj = params["w_proj"], params["b_proj"]  # (C, C),  (1, C)

    kind = _device_kind()
    vmem_limit = _vmem_limit_bytes()

    # --------------------- kernel A: QKV projection -------------------------
    tm = _pick_tile(M, (256, 128) if _is_v5e(kind) else (512, 256, 128))
    x2d = x.reshape(M, C)
    qkv = pl.pallas_call(
        _qkv_proj_kernel,
        out_shape=jax.ShapeDtypeStruct((M, 3 * C), x.dtype),
        grid=(M // tm,),
        in_specs=[
            pl.BlockSpec((tm, C), lambda i: (i, 0)),
            # constant block index -> fetched once, VMEM-resident across steps
            pl.BlockSpec((C, 3 * C), lambda i: (0, 0)),
            pl.BlockSpec((1, 3 * C), lambda i: (0, 0)),
        ],
        out_specs=pl.BlockSpec((tm, 3 * C), lambda i: (i, 0)),
        compiler_params=pltpu.CompilerParams(
            dimension_semantics=("parallel",),
            vmem_limit_bytes=vmem_limit),
    )(x2d, w_qkv, b_qkv)

    # ------------- layout plumbing (XLA, outside the kernels) ---------------
    # TODO(synk): emit head-major q/k/v directly from kernel A (or point kernel
    # B's BlockSpecs at qkv.reshape(B,T,3,H,D)) to drop this extra HBM round
    # trip; kept in XLA because the in-kernel lane-split relayout is not
    # guaranteed Mosaic-safe for D < 128.
    qkv = qkv.reshape(B, T, 3, n_head, D)
    q = qkv[:, :, 0].transpose(0, 2, 1, 3)   # (B, H, T, D)
    k = qkv[:, :, 1].transpose(0, 2, 1, 3)
    v = qkv[:, :, 2].transpose(0, 2, 1, 3)
    wp = w_proj.reshape(n_head, D, C)        # per-head row slabs of c_proj

    # ------------- kernel B: flash attention + fused c_proj -----------------
    d_tq, d_tk = _default_attn_tiles(T, kind)
    tq = tq or d_tq
    tk = tk or d_tk
    if (T % tq) or (T % tk):
        raise ValueError(f"tq={tq}, tk={tk} must divide T={T} (no tail masking).")
    # Keep B * (T // tq) >= 2 so both v7x TensorCores get parallel work.
    grid = (B, T // tq, T // tk)

    # bf16 exponentials only when activations are bf16 and the chip has a
    # bf16 EUP (not v5e); softmax bookkeeping stays f32 either way.
    exp_in_bf16 = (x.dtype == jnp.bfloat16) and not _is_v5e(kind)

    # Clamp the kv block index to the last on/below-diagonal tile for this
    # q-tile: fully-masked key tiles re-reference the previous block, so the
    # pipeline elides their DMA (compute is skipped by pl.when in the kernel).
    last_kv = lambda i: ((i + 1) * tq - 1) // tk
    kv_index = lambda b, i, j: (b, 0, jnp.minimum(j, last_kv(i)), 0)

    kernel = functools.partial(_flash_attn_kernel, n_head=n_head,
                               scale=1.0 / math.sqrt(D),
                               exp_in_bf16=exp_in_bf16)
    y = pl.pallas_call(
        kernel,
        out_shape=jax.ShapeDtypeStruct((B, T, C), x.dtype),
        grid=grid,
        in_specs=[
            pl.BlockSpec((1, n_head, tq, D), lambda b, i, j: (b, 0, i, 0)),
            pl.BlockSpec((1, n_head, tk, D), kv_index),
            pl.BlockSpec((1, n_head, tk, D), kv_index),
            # constant block index -> fetched once, VMEM-resident
            pl.BlockSpec((n_head, D, C), lambda b, i, j: (0, 0, 0)),
            pl.BlockSpec((1, C), lambda b, i, j: (0, 0)),
        ],
        out_specs=pl.BlockSpec((1, tq, C), lambda b, i, j: (b, i, 0)),
        scratch_shapes=[
            pltpu.VMEM((n_head, tq, 1), jnp.float32),   # running max
            pltpu.VMEM((n_head, tq, 1), jnp.float32),   # running denominator
            pltpu.VMEM((n_head, tq, D), jnp.float32),   # running numerator
        ],
        compiler_params=pltpu.CompilerParams(
            dimension_semantics=("parallel", "parallel", "arbitrary"),
            vmem_limit_bytes=vmem_limit),
    )(q, k, v, wp, b_proj)
    return y


# ---------------------------------------------------------------------------
# Pure-JAX reference (for correctness checking)
# ---------------------------------------------------------------------------
def causal_self_attention_ref(x, params, n_head):
    B, T, C = x.shape
    D = C // n_head
    qkv = x @ params["w_qkv"] + params["b_qkv"][0]
    q, k, v = jnp.split(qkv, 3, axis=-1)
    q = q.reshape(B, T, n_head, D).transpose(0, 2, 1, 3)
    k = k.reshape(B, T, n_head, D).transpose(0, 2, 1, 3)
    v = v.reshape(B, T, n_head, D).transpose(0, 2, 1, 3)
    att = jnp.einsum("bhtd,bhsd->bhts", q, k) / math.sqrt(D)
    mask = jnp.tril(jnp.ones((T, T), bool))
    att = jnp.where(mask[None, None], att, -jnp.inf)
    att = jax.nn.softmax(att, axis=-1)
    y = jnp.einsum("bhts,bhsd->bhtd", att, v).transpose(0, 2, 1, 3).reshape(B, T, C)
    return y @ params["w_proj"] + params["b_proj"][0]


# ---------------------------------------------------------------------------
# Main
# ---------------------------------------------------------------------------
if __name__ == "__main__":
    # Small shapes, but T > tile so the online-softmax loop, the clamped-DMA
    # causal skipping and the fused epilogue all get exercised.
    B, T, C, n_head = 2, 128, 64, 4          # head dim D = 16
    std = 0.1

    root = jax.random.PRNGKey(0)
    kx, k1, k2, k3, k4 = jax.random.split(root, 5)
    params = {
        # Linear weights stored as [in, out]  (kernel computes x @ W + b;
        # values equivalent to PyTorch's x @ W.T with W stored [out, in]).
        "w_qkv": std * jax.random.normal(k1, (C, 3 * C), jnp.float32),
        "b_qkv": std * jax.random.normal(k2, (1, 3 * C), jnp.float32),
        "w_proj": std * jax.random.normal(k3, (C, C), jnp.float32),
        "b_proj": std * jax.random.normal(k4, (1, C), jnp.float32),
    }
    x = jax.random.normal(kx, (B, T, C), jnp.float32)
    # For bf16 MXU throughput on v6e/v7x, pass bf16 x / params — softmax
    # bookkeeping and matmul accumulation stay in f32 inside the kernels.

    out = jax.block_until_ready(
        causal_self_attention(x, params, n_head, tq=64, tk=64))
    ref = jax.block_until_ready(causal_self_attention_ref(x, params, n_head))

    assert out.shape == (B, T, C)
    err = float(jnp.max(jnp.abs(out - ref)))
    # Softmax normalization is now an exact f32 divide; the remaining budget
    # covers TPU default-precision f32 matmuls (bf16 MXU passes) differing in
    # decomposition between the fused kernel and the XLA reference.
    assert err <= 1e-2, f"max abs err = {err}"
    print("KERNEL_OK")
</pallas_src>

<mosaic_0001>
module attributes {stable_mosaic.version = 11 : i64} {
  func.func @_qkv_proj_kernel(%arg0: i32, %arg1: memref<256x64xf32, #tpu.memory_space<vmem>>, %arg2: memref<64x192xf32, #tpu.memory_space<vmem>>, %arg3: memref<1x192xf32, #tpu.memory_space<vmem>>, %arg4: memref<256x192xf32, #tpu.memory_space<vmem>>) attributes {dimension_semantics = [#tpu.dimension_semantics<parallel>], iteration_bounds = array<i64: 1>, scalar_prefetch = 0 : i64, scratch_operands = 0 : i64, tpu.core_type = #tpu.core_type<tc>, window_params = [{transform_indices = @transform_0, window_bounds = array<i64: 256, 64>}, {pipeline_mode = #tpu.pipeline_mode<synchronous>, transform_indices = @transform_1, window_bounds = array<i64: 64, 192>}, {pipeline_mode = #tpu.pipeline_mode<synchronous>, transform_indices = @transform_2, window_bounds = array<i64: 1, 192>}, {transform_indices = @transform_3, window_bounds = array<i64: 256, 192>}]} {
    %c0 = arith.constant 0 : index
    %c0_0 = arith.constant 0 : index
    %0 = vector.load %arg1[%c0, %c0_0] : memref<256x64xf32, #tpu.memory_space<vmem>>, vector<256x64xf32>
    %c0_1 = arith.constant 0 : index
    %c0_2 = arith.constant 0 : index
    %1 = vector.load %arg2[%c0_1, %c0_2] : memref<64x192xf32, #tpu.memory_space<vmem>>, vector<64x192xf32>
    %cst = arith.constant dense<0.000000e+00> : vector<256x192xf32>
    %2 = tpu.matmul %0, %1, %cst {dimension_numbers = #tpu.dot_dimension_numbers<[1], [0], [0], [1], [0, 0, 1, 1], [], []>} : vector<256x64xf32>, vector<64x192xf32>, vector<256x192xf32> -> vector<256x192xf32>
    %c0_3 = arith.constant 0 : index
    %c0_4 = arith.constant 0 : index
    %3 = vector.load %arg3[%c0_3, %c0_4] : memref<1x192xf32, #tpu.memory_space<vmem>>, vector<1x192xf32>
    %4 = vector.broadcast %3 : vector<1x192xf32> to vector<256x192xf32>
    %5 = arith.addf %2, %4 : vector<256x192xf32>
    %c0_5 = arith.constant 0 : index
    %c0_6 = arith.constant 0 : index
    %6 = vector.load %arg4[%c0_5, %c0_6] : memref<256x192xf32, #tpu.memory_space<vmem>>, vector<256x192xf32>
    tpu.vector_store %arg4[%c0_5, %c0_6], %5 {strides = array<i32>} : memref<256x192xf32, #tpu.memory_space<vmem>>, vector<256x192xf32>,
    return
  }
  func.func @transform_0(%arg0: i32) -> (i32, i32) {
    %c0_i32 = arith.constant 0 : i32
    %c0_i32_0 = arith.constant 0 : i32
    return %arg0, %c0_i32 : i32, i32
  }
  func.func @transform_1(%arg0: i32) -> (i32, i32) {
    %c0_i32 = arith.constant 0 : i32
    %c0_i32_0 = arith.constant 0 : i32
    %c0_i32_1 = arith.constant 0 : i32
    return %c0_i32, %c0_i32_0 : i32, i32
  }
  func.func @transform_2(%arg0: i32) -> (i32, i32) {
    %c0_i32 = arith.constant 0 : i32
    %c0_i32_0 = arith.constant 0 : i32
    %c0_i32_1 = arith.constant 0 : i32
    return %c0_i32, %c0_i32_0 : i32, i32
  }
  func.func @transform_3(%arg0: i32) -> (i32, i32) {
    %c0_i32 = arith.constant 0 : i32
    %c0_i32_0 = arith.constant 0 : i32
    return %arg0, %c0_i32 : i32, i32
  }
}

</mosaic_0001>

<bundles_post_ra>
// kernel: tpu_custom_call.1
= control target key start
LH: loop header
LB: loop body
LE: loop exit
PB: predicated region body
PF: predicated region fallthrough
CT: control target
= control target key end

     0   :  { %v545_v3 = vmov 0.0   ;;  %vm74_vm0 = vcmask 523264   ;;  %v64_v49 = vlaneseq  ;;  %s1069_s1 = inlined_call_operand.vmem [shape: f32[64,192], index: 1, kind: input, shape index: {}]   ;;  %s1070_s0 = inlined_call_operand.vmem [shape: f32[256,64], index: 0, kind: input, shape index: {}]   ;;  %s1071_s2 = inlined_call_operand.vmem [shape: f32[1,192], index: 2, kind: input, shape index: {}]   ;;  %s1072_s3 = inlined_call_operand.vmem [shape: f32[256,192], index: 3, kind: output, shape index: {}]  }
   0x1   :  { %v61_v0 = vld [vmem:[%s1069_s1 + $0x78] sm:$0xff]  ;;  %v60_v1 = vld [vmem:[%s1069_s1 + $0x70] sm:$0xff]  ;;  %v59_v2 = vld [vmem:[%s1069_s1 + $0x68] sm:$0xff]  ;;  %235 = vmatprep.mubr.f32.mxu0 %v545_v3  ;;  %331 = vmatprep.mubr.f32.mxu1 %v545_v3 }
   0x2   :  { %187 = vmatprep.subr.mxu0 %v61_v0  ;;  %528 = vmatprep.subr.mxu1 %v61_v0  ;;  %v58_v4 = vld [vmem:[%s1069_s1 + $0x60] sm:$0xff]  ;;  %v57_v5 = vld [vmem:[%s1069_s1 + $0x58] sm:$0xff]  ;;  %v56_v6 = vld [vmem:[%s1069_s1 + $0x50] sm:$0xff]  ;;  %v65_v50 = vshrl.u32 %v64_v49, 7 }
   0x3   :  { %188 = vmatpush1.msra.mxu0 %v60_v1  ;;  %536 = vmatpush1.msra.mxu1 %v60_v1  ;;  %v55_v7 = vld [vmem:[%s1069_s1 + $0x48] sm:$0xff]  ;;  %v54_v8 = vld [vmem:[%s1069_s1 + $0x40] sm:$0xff]  ;;  %v53_v9 = vld [vmem:[%s1069_s1 + $0x38] sm:$0xff] }
   0x4   :  { %189 = vmatprep.subr.mxu0 %v59_v2  ;;  %529 = vmatprep.subr.mxu1 %v59_v2  ;;  %v52_v10 = vld [vmem:[%s1069_s1 + $0x30] sm:$0xff]  ;;  %v51_v11 = vld [vmem:[%s1069_s1 + $0x28] sm:$0xff]  ;;  %v50_v12 = vld [vmem:[%s1069_s1 + $0x20] sm:$0xff]  ;;  %v66_v51 = vsub.s32 0, %v65_v50  ;;  %v70_v53 = vsub.s32 1, %v65_v50 }
   0x5   :  { %190 = vmatpush1.msra.mxu0 %v58_v4  ;;  %537 = vmatpush1.msra.mxu1 %v58_v4  ;;  %v49_v13 = vld [vmem:[%s1069_s1 + $0x18] sm:$0xff]  ;;  %v48_v14 = vld [vmem:[%s1069_s1 + $0x10] sm:$0xff]  ;;  %v47_v15 = vld [vmem:[%s1069_s1 + $0x8] sm:$0xff] }
   0x6   :  { %191 = vmatprep.subr.mxu0 %v57_v5  ;;  %530 = vmatprep.subr.mxu1 %v57_v5  ;;  %v46_v16 = vld [vmem:[%s1069_s1] sm:$0xff]  ;;  %v15_v19 = vld [vmem:[%s1070_s0 + $0x8] sm:$0xff]  ;;  %v16_v21 = vld [vmem:[%s1070_s0 + $0x10] sm:$0xff] }
   0x7   :  { %192 = vmatpush1.msra.mxu0 %v56_v6  ;;  %538 = vmatpush1.msra.mxu1 %v56_v6  ;;  %v14_v17 = vld [vmem:[%s1070_s0] sm:$0xff]  ;;  %v31_v20 = vld [vmem:[%s1070_s0 + $0x88] sm:$0xff]  ;;  %v32_v22 = vld [vmem:[%s1070_s0 + $0x90] sm:$0xff] }
   0x8   :  { %193 = vmatprep.subr.mxu0 %v55_v7  ;;  %531 = vmatprep.subr.mxu1 %v55_v7  ;;  %v30_v18 = vld [vmem:[%s1070_s0 + $0x80] sm:$0xff]  ;;  %v17_v23 = vld [vmem:[%s1070_s0 + $0x18] sm:$0xff]  ;;  %v19_v27 = vld [vmem:[%s1070_s0 + $0x28] sm:$0xff] }
   0x9   :  { %194 = vmatpush1.msra.mxu0 %v54_v8  ;;  %539 = vmatpush1.msra.mxu1 %v54_v8  ;;  %v33_v24 = vld [vmem:[%s1070_s0 + $0x98] sm:$0xff]  ;;  %v18_v25 = vld [vmem:[%s1070_s0 + $0x20] sm:$0xff]  ;;  %v35_v28 = vld [vmem:[%s1070_s0 + $0xa8] sm:$0xff] }
   0xa   :  { %195 = vmatprep.subr.mxu0 %v53_v9  ;;  %532 = vmatprep.subr.mxu1 %v53_v9  ;;  %v34_v26 = vld [vmem:[%s1070_s0 + $0xa0] sm:$0xff]  ;;  %v20_v29 = vld [vmem:[%s1070_s0 + $0x30] sm:$0xff]  ;;  %v21_v31 = vld [vmem:[%s1070_s0 + $0x38] sm:$0xff] }
   0xb   :  { %196 = vmatpush1.msra.mxu0 %v52_v10  ;;  %540 = vmatpush1.msra.mxu1 %v52_v10  ;;  %v36_v30 = vld [vmem:[%s1070_s0 + $0xb0] sm:$0xff]  ;;  %v37_v32 = vld [vmem:[%s1070_s0 + $0xb8] sm:$0xff]  ;;  %v22_v33 = vld [vmem:[%s1070_s0 + $0x40] sm:$0xff] }
   0xc   :  { %197 = vmatprep.subr.mxu0 %v51_v11  ;;  %533 = vmatprep.subr.mxu1 %v51_v11  ;;  %v38_v34 = vld [vmem:[%s1070_s0 + $0xc0] sm:$0xff]  ;;  %v23_v35 = vld [vmem:[%s1070_s0 + $0x48] sm:$0xff]  ;;  %v24_v37 = vld [vmem:[%s1070_s0 + $0x50] sm:$0xff] }
   0xd   :  { %198 = vmatpush1.msra.mxu0 %v50_v12  ;;  %541 = vmatpush1.msra.mxu1 %v50_v12  ;;  %v39_v36 = vld [vmem:[%s1070_s0 + $0xc8] sm:$0xff]  ;;  %v40_v38 = vld [vmem:[%s1070_s0 + $0xd0] sm:$0xff]  ;;  %v25_v39 = vld [vmem:[%s1070_s0 + $0x58] sm:$0xff] }
   0xe   :  { %199 = vmatprep.subr.mxu0 %v49_v13  ;;  %534 = vmatprep.subr.mxu1 %v49_v13  ;;  %v41_v40 = vld [vmem:[%s1070_s0 + $0xd8] sm:$0xff]  ;;  %v26_v41 = vld [vmem:[%s1070_s0 + $0x60] sm:$0xff]  ;;  %v27_v43 = vld [vmem:[%s1070_s0 + $0x68] sm:$0xff] }
   0xf   :  { %200 = vmatpush1.msra.mxu0 %v48_v14  ;;  %542 = vmatpush1.msra.mxu1 %v48_v14  ;;  %v42_v42 = vld [vmem:[%s1070_s0 + $0xe0] sm:$0xff]  ;;  %v43_v44 = vld [vmem:[%s1070_s0 + $0xe8] sm:$0xff]  ;;  %v28_v45 = vld [vmem:[%s1070_s0 + $0x70] sm:$0xff] }
  0x10   :  { %201 = vmatprep.subr.mxu0 %v47_v15  ;;  %535 = vmatprep.subr.mxu1 %v47_v15  ;;  %v44_v46 = vld [vmem:[%s1070_s0 + $0xf0] sm:$0xff]  ;;  %v29_v47 = vld [vmem:[%s1070_s0 + $0x78] sm:$0xff]  ;;  %v62_v52 = vld [vmem:[%s1071_s2] sm:$0x3] }
  0x11   :  { %202 = vmatpush1.msra.mxu0 %v46_v16  ;;  %543 = vmatpush1.msra.mxu1 %v46_v16  ;;  %v45_v48 = vld [vmem:[%s1070_s0 + $0xf8] sm:$0xff]  ;;  %v777_v54 = vrot.slane %v62_v52, %v66_v51  ;;  %v779_v55 = vrot.slane %v62_v52, %v70_v53 }
  0x12   :  { %496 = vmatmul.mubr.msk.f32.vlgmr.msra.gmra.mxu0 %vm74_vm0, %v14_v17  ;;  %512 = vmatmul.mubr.msk.f32.vlgmr.msra.gmra.mxu1 %vm74_vm0, %v30_v18 }
  0x13   :  { %241 = vmatprep.mubr.f32.mxu0 %v545_v3  ;;  %337 = vmatprep.mubr.f32.mxu1 %v545_v3 }
  0x16   :  { %497 = vmatmul.mubr.msk.f32.gmra.mxu0 %vm74_vm0, %v15_v19  ;;  %513 = vmatmul.mubr.msk.f32.gmra.mxu1 %vm74_vm0, %v31_v20 }
  0x17   :  { %247 = vmatprep.mubr.f32.mxu0 %v545_v3  ;;  %343 = vmatprep.mubr.f32.mxu1 %v545_v3 }
  0x1a   :  { %498 = vmatmul.mubr.msk.f32.gmra.mxu0 %vm74_vm0, %v16_v21  ;;  %514 = vmatmul.mubr.msk.f32.gmra.mxu1 %vm74_vm0, %v32_v22 }
  0x1b   :  { %253 = vmatprep.mubr.f32.mxu0 %v545_v3  ;;  %349 = vmatprep.mubr.f32.mxu1 %v545_v3 }
  0x1e   :  { %499 = vmatmul.mubr.msk.f32.gmra.mxu0 %vm74_vm0, %v17_v23  ;;  %515 = vmatmul.mubr.msk.f32.gmra.mxu1 %vm74_vm0, %v33_v24 }
  0x1f   :  { %259 = vmatprep.mubr.f32.mxu0 %v545_v3  ;;  %355 = vmatprep.mubr.f32.mxu1 %v545_v3 }
  0x22   :  { %500 = vmatmul.mubr.msk.f32.gmra.mxu0 %vm74_vm0, %v18_v25  ;;  %516 = vmatmul.mubr.msk.f32.gmra.mxu1 %vm74_vm0, %v34_v26 }
  0x23   :  { %265 = vmatprep.mubr.f32.mxu0 %v545_v3  ;;  %361 = vmatprep.mubr.f32.mxu1 %v545_v3 }
  0x26   :  { %501 = vmatmul.mubr.msk.f32.gmra.mxu0 %vm74_vm0, %v19_v27  ;;  %517 = vmatmul.mubr.msk.f32.gmra.mxu1 %vm74_vm0, %v35_v28 }
  0x27   :  { %271 = vmatprep.mubr.f32.mxu0 %v545_v3  ;;  %367 = vmatprep.mubr.f32.mxu1 %v545_v3 }
  0x2a   :  { %502 = vmatmul.mubr.msk.f32.gmra.mxu0 %vm74_vm0, %v20_v29  ;;  %518 = vmatmul.mubr.msk.f32.gmra.mxu1 %vm74_vm0, %v36_v30 }
  0x2b   :  { %277 = vmatprep.mubr.f32.mxu0 %v545_v3  ;;  %373 = vmatprep.mubr.f32.mxu1 %v545_v3 }
  0x2e   :  { %503 = vmatmul.mubr.msk.f32.gmra.mxu0 %vm74_vm0, %v21_v31  ;;  %519 = vmatmul.mubr.msk.f32.gmra.mxu1 %vm74_vm0, %v37_v32 }
  0x2f   :  { %283 = vmatprep.mubr.f32.mxu0 %v545_v3  ;;  %379 = vmatprep.mubr.f32.mxu1 %v545_v3 }
  0x32   :  { %504 = vmatmul.mubr.msk.f32.gmra.mxu0 %vm74_vm0, %v22_v33  ;;  %520 = vmatmul.mubr.msk.f32.gmra.mxu1 %vm74_vm0, %v38_v34 }
  0x33   :  { %289 = vmatprep.mubr.f32.mxu0 %v545_v3  ;;  %385 = vmatprep.mubr.f32.mxu1 %v545_v3 }
  0x36   :  { %505 = vmatmul.mubr.msk.f32.gmra.mxu0 %vm74_vm0, %v23_v35  ;;  %521 = vmatmul.mubr.msk.f32.gmra.mxu1 %vm74_vm0, %v39_v36 }
  0x37   :  { %295 = vmatprep.mubr.f32.mxu0 %v545_v3  ;;  %391 = vmatprep.mubr.f32.mxu1 %v545_v3 }
  0x3a   :  { %506 = vmatmul.mubr.msk.f32.gmra.mxu0 %vm74_vm0, %v24_v37  ;;  %522 = vmatmul.mubr.msk.f32.gmra.mxu1 %vm74_vm0, %v40_v38 }
  0x3b   :  { %301 = vmatprep.mubr.f32.mxu0 %v545_v3  ;;  %397 = vmatprep.mubr.f32.mxu1 %v545_v3 }
  0x3e   :  { %507 = vmatmul.mubr.msk.f32.gmra.mxu0 %vm74_vm0, %v25_v39  ;;  %523 = vmatmul.mubr.msk.f32.gmra.mxu1 %vm74_vm0, %v41_v40 }
  0x3f   :  { %307 = vmatprep.mubr.f32.mxu0 %v545_v3  ;;  %403 = vmatprep.mubr.f32.mxu1 %v545_v3 }
  0x42   :  { %508 = vmatmul.mubr.msk.f32.gmra.mxu0 %vm74_vm0, %v26_v41  ;;  %524 = vmatmul.mubr.msk.f32.gmra.mxu1 %vm74_vm0, %v42_v42 }
  0x43   :  { %313 = vmatprep.mubr.f32.mxu0 %v545_v3  ;;  %409 = vmatprep.mubr.f32.mxu1 %v545_v3 }
  0x46   :  { %509 = vmatmul.mubr.msk.f32.gmra.mxu0 %vm74_vm0, %v27_v43  ;;  %525 = vmatmul.mubr.msk.f32.gmra.mxu1 %vm74_vm0, %v43_v44 }
  0x47   :  { %319 = vmatprep.mubr.f32.mxu0 %v545_v3  ;;  %415 = vmatprep.mubr.f32.mxu1 %v545_v3 }
  0x4a   :  { %510 = vmatmul.mubr.msk.f32.gmra.mxu0 %vm74_vm0, %v28_v45  ;;  %526 = vmatmul.mubr.msk.f32.gmra.mxu1 %vm74_vm0, %v44_v46 }
  0x4b   :  { %325 = vmatprep.mubr.f32.mxu0 %v545_v3  ;;  %421 = vmatprep.mubr.f32.mxu1 %v545_v3 }
  0x4e   :  { %511 = vmatmul.mubr.msk.f32.gmra.mxu0 %vm74_vm0, %v29_v47  ;;  %527 = vmatmul.mubr.msk.f32.gmra.mxu1 %vm74_vm0, %v45_v48 }
  0xd2   :  { %v237_v56 = vpop.f32.mrf.mxu0  ;;  %v333_v57 = vpop.f32.mrf.mxu1 }
  0xd3   :  { %v238_v58 = vadd.f32 %v237_v56, %v777_v54  ;;  %v334_v59 = vadd.f32 %v333_v57, %v777_v54 }
  0xd4   :  { %v239_v60 = vpop.f32.mrf.mxu0  ;;  %v335_v61 = vpop.f32.mrf.mxu1 }
  0xd5   :  { %428 = vst [vmem:[%s1072_s3] sm:$0xff] %v238_v58  ;;  %460 = vst [vmem:[%s1072_s3 + $0x100] sm:$0xff] %v334_v59  ;;  %v240_v62 = vadd.f32 %v239_v60, %v779_v55  ;;  %v336_v63 = vadd.f32 %v335_v61, %v779_v55 }
  0xd6   :  { %v243_v0 = vpop.f32.mrf.mxu0  ;;  %v339_v1 = vpop.f32.mrf.mxu1 }
  0xd7   :  { %429 = vst.msk [vmem:[%s1072_s3 + $0x8] sm:$0xff] %vm74_vm0, %v240_v62  ;;  %461 = vst.msk [vmem:[%s1072_s3 + $0x108] sm:$0xff] %vm74_vm0, %v336_v63  ;;  %v244_v2 = vadd.f32 %v243_v0, %v777_v54  ;;  %v340_v3 = vadd.f32 %v339_v1, %v777_v54 }
  0xd8   :  { %v245_v4 = vpop.f32.mrf.mxu0  ;;  %v341_v5 = vpop.f32.mrf.mxu1 }
  0xd9   :  { %430 = vst [vmem:[%s1072_s3 + $0x10] sm:$0xff] %v244_v2  ;;  %462 = vst [vmem:[%s1072_s3 + $0x110] sm:$0xff] %v340_v3  ;;  %v246_v6 = vadd.f32 %v245_v4, %v779_v55  ;;  %v342_v7 = vadd.f32 %v341_v5, %v779_v55 }
  0xda   :  { %v249_v8 = vpop.f32.mrf.mxu0  ;;  %v345_v9 = vpop.f32.mrf.mxu1 }
  0xdb   :  { %431 = vst.msk [vmem:[%s1072_s3 + $0x18] sm:$0xff] %vm74_vm0, %v246_v6  ;;  %463 = vst.msk [vmem:[%s1072_s3 + $0x118] sm:$0xff] %vm74_vm0, %v342_v7  ;;  %v250_v10 = vadd.f32 %v249_v8, %v777_v54  ;;  %v346_v11 = vadd.f32 %v345_v9, %v777_v54 }
  0xdc   :  { %v251_v12 = vpop.f32.mrf.mxu0  ;;  %v347_v13 = vpop.f32.mrf.mxu1 }
  0xdd   :  { %432 = vst [vmem:[%s1072_s3 + $0x20] sm:$0xff] %v250_v10  ;;  %464 = vst [vmem:[%s1072_s3 + $0x120] sm:$0xff] %v346_v11  ;;  %v252_v14 = vadd.f32 %v251_v12, %v779_v55  ;;  %v348_v15 = vadd.f32 %v347_v13, %v779_v55 }
  0xde   :  { %v255_v16 = vpop.f32.mrf.mxu0  ;;  %v351_v17 = vpop.f32.mrf.mxu1 }
  0xdf   :  { %433 = vst.msk [vmem:[%s1072_s3 + $0x28] sm:$0xff] %vm74_vm0, %v252_v14  ;;  %465 = vst.msk [vmem:[%s1072_s3 + $0x128] sm:$0xff] %vm74_vm0, %v348_v15  ;;  %v256_v18 = vadd.f32 %v255_v16, %v777_v54  ;;  %v352_v19 = vadd.f32 %v351_v17, %v777_v54 }
  0xe0   :  { %v257_v20 = vpop.f32.mrf.mxu0  ;;  %v353_v21 = vpop.f32.mrf.mxu1 }
  0xe1   :  { %434 = vst [vmem:[%s1072_s3 + $0x30] sm:$0xff] %v256_v18  ;;  %466 = vst [vmem:[%s1072_s3 + $0x130] sm:$0xff] %v352_v19  ;;  %v258_v22 = vadd.f32 %v257_v20, %v779_v55  ;;  %v354_v23 = vadd.f32 %v353_v21, %v779_v55 }
  0xe2   :  { %v261_v24 = vpop.f32.mrf.mxu0  ;;  %v357_v25 = vpop.f32.mrf.mxu1 }
  0xe3   :  { %435 = vst.msk [vmem:[%s1072_s3 + $0x38] sm:$0xff] %vm74_vm0, %v258_v22  ;;  %467 = vst.msk [vmem:[%s1072_s3 + $0x138] sm:$0xff] %vm74_vm0, %v354_v23  ;;  %v262_v26 = vadd.f32 %v261_v24, %v777_v54  ;;  %v358_v27 = vadd.f32 %v357_v25, %v777_v54 }
  0xe4   :  { %v263_v28 = vpop.f32.mrf.mxu0  ;;  %v359_v29 = vpop.f32.mrf.mxu1 }
  0xe5   :  { %436 = vst [vmem:[%s1072_s3 + $0x40] sm:$0xff] %v262_v26  ;;  %468 = vst [vmem:[%s1072_s3 + $0x140] sm:$0xff] %v358_v27  ;;  %v264_v30 = vadd.f32 %v263_v28, %v779_v55  ;;  %v360_v31 = vadd.f32 %v359_v29, %v779_v55 }
  0xe6   :  { %v267_v32 = vpop.f32.mrf.mxu0  ;;  %v363_v33 = vpop.f32.mrf.mxu1 }
  0xe7   :  { %437 = vst.msk [vmem:[%s1072_s3 + $0x48] sm:$0xff] %vm74_vm0, %v264_v30  ;;  %469 = vst.msk [vmem:[%s1072_s3 + $0x148] sm:$0xff] %vm74_vm0, %v360_v31  ;;  %v268_v34 = vadd.f32 %v267_v32, %v777_v54  ;;  %v364_v35 = vadd.f32 %v363_v33, %v777_v54 }
  0xe8   :  { %v269_v36 = vpop.f32.mrf.mxu0  ;;  %v365_v37 = vpop.f32.mrf.mxu1 }
  0xe9   :  { %438 = vst [vmem:[%s1072_s3 + $0x50] sm:$0xff] %v268_v34  ;;  %470 = vst [vmem:[%s1072_s3 + $0x150] sm:$0xff] %v364_v35  ;;  %v270_v38 = vadd.f32 %v269_v36, %v779_v55  ;;  %v366_v39 = vadd.f32 %v365_v37, %v779_v55 }
  0xea   :  { %v273_v40 = vpop.f32.mrf.mxu0  ;;  %v369_v41 = vpop.f32.mrf.mxu1 }
  0xeb   :  { %439 = vst.msk [vmem:[%s1072_s3 + $0x58] sm:$0xff] %vm74_vm0, %v270_v38  ;;  %471 = vst.msk [vmem:[%s1072_s3 + $0x158] sm:$0xff] %vm74_vm0, %v366_v39  ;;  %v274_v42 = vadd.f32 %v273_v40, %v777_v54  ;;  %v370_v43 = vadd.f32 %v369_v41, %v777_v54 }
  0xec   :  { %v275_v44 = vpop.f32.mrf.mxu0  ;;  %v371_v45 = vpop.f32.mrf.mxu1 }
  0xed   :  { %440 = vst [vmem:[%s1072_s3 + $0x60] sm:$0xff] %v274_v42  ;;  %472 = vst [vmem:[%s1072_s3 + $0x160] sm:$0xff] %v370_v43  ;;  %v276_v46 = vadd.f32 %v275_v44, %v779_v55  ;;  %v372_v47 = vadd.f32 %v371_v45, %v779_v55 }
  0xee   :  { %v279_v48 = vpop.f32.mrf.mxu0  ;;  %v375_v49 = vpop.f32.mrf.mxu1 }
  0xef   :  { %441 = vst.msk [vmem:[%s1072_s3 + $0x68] sm:$0xff] %vm74_vm0, %v276_v46  ;;  %473 = vst.msk [vmem:[%s1072_s3 + $0x168] sm:$0xff] %vm74_vm0, %v372_v47  ;;  %v280_v50 = vadd.f32 %v279_v48, %v777_v54  ;;  %v376_v51 = vadd.f32 %v375_v49, %v777_v54 }
  0xf0   :  { %v281_v52 = vpop.f32.mrf.mxu0  ;;  %v377_v53 = vpop.f32.mrf.mxu1 }
  0xf1   :  { %442 = vst [vmem:[%s1072_s3 + $0x70] sm:$0xff] %v280_v50  ;;  %474 = vst [vmem:[%s1072_s3 + $0x170] sm:$0xff] %v376_v51  ;;  %v282_v56 = vadd.f32 %v281_v52, %v779_v55  ;;  %v378_v57 = vadd.f32 %v377_v53, %v779_v55 }
  0xf2   :  { %v285_v58 = vpop.f32.mrf.mxu0  ;;  %v381_v59 = vpop.f32.mrf.mxu1 }
  0xf3   :  { %443 = vst.msk [vmem:[%s1072_s3 + $0x78] sm:$0xff] %vm74_vm0, %v282_v56  ;;  %475 = vst.msk [vmem:[%s1072_s3 + $0x178] sm:$0xff] %vm74_vm0, %v378_v57  ;;  %v286_v60 = vadd.f32 %v285_v58, %v777_v54  ;;  %v382_v61 = vadd.f32 %v381_v59, %v777_v54 }
  0xf4   :  { %v287_v62 = vpop.f32.mrf.mxu0  ;;  %v383_v63 = vpop.f32.mrf.mxu1 }
  0xf5   :  { %444 = vst [vmem:[%s1072_s3 + $0x80] sm:$0xff] %v286_v60  ;;  %476 = vst [vmem:[%s1072_s3 + $0x180] sm:$0xff] %v382_v61  ;;  %v288_v0 = vadd.f32 %v287_v62, %v779_v55  ;;  %v384_v1 = vadd.f32 %v383_v63, %v779_v55 }
  0xf6   :  { %v291_v2 = vpop.f32.mrf.mxu0  ;;  %v387_v3 = vpop.f32.mrf.mxu1 }
  0xf7   :  { %445 = vst.msk [vmem:[%s1072_s3 + $0x88] sm:$0xff] %vm74_vm0, %v288_v0  ;;  %477 = vst.msk [vmem:[%s1072_s3 + $0x188] sm:$0xff] %vm74_vm0, %v384_v1  ;;  %v292_v4 = vadd.f32 %v291_v2, %v777_v54  ;;  %v388_v5 = vadd.f32 %v387_v3, %v777_v54 }
  0xf8   :  { %v293_v6 = vpop.f32.mrf.mxu0  ;;  %v389_v7 = vpop.f32.mrf.mxu1 }
  0xf9   :  { %446 = vst [vmem:[%s1072_s3 + $0x90] sm:$0xff] %v292_v4  ;;  %478 = vst [vmem:[%s1072_s3 + $0x190] sm:$0xff] %v388_v5  ;;  %v294_v8 = vadd.f32 %v293_v6, %v779_v55  ;;  %v390_v9 = vadd.f32 %v389_v7, %v779_v55 }
  0xfa   :  { %v297_v10 = vpop.f32.mrf.mxu0  ;;  %v393_v11 = vpop.f32.mrf.mxu1 }
  0xfb   :  { %447 = vst.msk [vmem:[%s1072_s3 + $0x98] sm:$0xff] %vm74_vm0, %v294_v8  ;;  %479 = vst.msk [vmem:[%s1072_s3 + $0x198] sm:$0xff] %vm74_vm0, %v390_v9  ;;  %v298_v12 = vadd.f32 %v297_v10, %v777_v54  ;;  %v394_v13 = vadd.f32 %v393_v11, %v777_v54 }
  0xfc   :  { %v299_v14 = vpop.f32.mrf.mxu0  ;;  %v395_v15 = vpop.f32.mrf.mxu1 }
  0xfd   :  { %448 = vst [vmem:[%s1072_s3 + $0xa0] sm:$0xff] %v298_v12  ;;  %480 = vst [vmem:[%s1072_s3 + $0x1a0] sm:$0xff] %v394_v13  ;;  %v300_v16 = vadd.f32 %v299_v14, %v779_v55  ;;  %v396_v17 = vadd.f32 %v395_v15, %v779_v55 }
  0xfe   :  { %v303_v18 = vpop.f32.mrf.mxu0  ;;  %v399_v19 = vpop.f32.mrf.mxu1 }
  0xff   :  { %449 = vst.msk [vmem:[%s1072_s3 + $0xa8] sm:$0xff] %vm74_vm0, %v300_v16  ;;  %481 = vst.msk [vmem:[%s1072_s3 + $0x1a8] sm:$0xff] %vm74_vm0, %v396_v17  ;;  %v304_v20 = vadd.f32 %v303_v18, %v777_v54  ;;  %v400_v21 = vadd.f32 %v399_v19, %v777_v54 }
 0x100   :  { %v305_v22 = vpop.f32.mrf.mxu0  ;;  %v401_v23 = vpop.f32.mrf.mxu1 }
 0x101   :  { %450 = vst [vmem:[%s1072_s3 + $0xb0] sm:$0xff] %v304_v20  ;;  %482 = vst [vmem:[%s1072_s3 + $0x1b0] sm:$0xff] %v400_v21  ;;  %v306_v24 = vadd.f32 %v305_v22, %v779_v55  ;;  %v402_v25 = vadd.f32 %v401_v23, %v779_v55 }
 0x102   :  { %v309_v26 = vpop.f32.mrf.mxu0  ;;  %v405_v27 = vpop.f32.mrf.mxu1 }
 0x103   :  { %451 = vst.msk [vmem:[%s1072_s3 + $0xb8] sm:$0xff] %vm74_vm0, %v306_v24  ;;  %483 = vst.msk [vmem:[%s1072_s3 + $0x1b8] sm:$0xff] %vm74_vm0, %v402_v25  ;;  %v310_v28 = vadd.f32 %v309_v26, %v777_v54  ;;  %v406_v29 = vadd.f32 %v405_v27, %v777_v54 }
 0x104   :  { %v311_v30 = vpop.f32.mrf.mxu0  ;;  %v407_v31 = vpop.f32.mrf.mxu1 }
 0x105   :  { %452 = vst [vmem:[%s1072_s3 + $0xc0] sm:$0xff] %v310_v28  ;;  %484 = vst [vmem:[%s1072_s3 + $0x1c0] sm:$0xff] %v406_v29  ;;  %v312_v32 = vadd.f32 %v311_v30, %v779_v55  ;;  %v408_v33 = vadd.f32 %v407_v31, %v779_v55 }
 0x106   :  { %v315_v34 = vpop.f32.mrf.mxu0  ;;  %v411_v35 = vpop.f32.mrf.mxu1 }
 0x107   :  { %453 = vst.msk [vmem:[%s1072_s3 + $0xc8] sm:$0xff] %vm74_vm0, %v312_v32  ;;  %485 = vst.msk [vmem:[%s1072_s3 + $0x1c8] sm:$0xff] %vm74_vm0, %v408_v33  ;;  %v316_v36 = vadd.f32 %v315_v34, %v777_v54  ;;  %v412_v37 = vadd.f32 %v411_v35, %v777_v54 }
 0x108   :  { %v317_v38 = vpop.f32.mrf.mxu0  ;;  %v413_v39 = vpop.f32.mrf.mxu1 }
 0x109   :  { %454 = vst [vmem:[%s1072_s3 + $0xd0] sm:$0xff] %v316_v36  ;;  %486 = vst [vmem:[%s1072_s3 + $0x1d0] sm:$0xff] %v412_v37  ;;  %v318_v40 = vadd.f32 %v317_v38, %v779_v55  ;;  %v414_v41 = vadd.f32 %v413_v39, %v779_v55 }
 0x10a   :  { %v321_v42 = vpop.f32.mrf.mxu0  ;;  %v417_v43 = vpop.f32.mrf.mxu1 }
 0x10b   :  { %455 = vst.msk [vmem:[%s1072_s3 + $0xd8] sm:$0xff] %vm74_vm0, %v318_v40  ;;  %487 = vst.msk [vmem:[%s1072_s3 + $0x1d8] sm:$0xff] %vm74_vm0, %v414_v41  ;;  %v322_v44 = vadd.f32 %v321_v42, %v777_v54  ;;  %v418_v45 = vadd.f32 %v417_v43, %v777_v54 }
 0x10c   :  { %v323_v46 = vpop.f32.mrf.mxu0  ;;  %v419_v47 = vpop.f32.mrf.mxu1 }
 0x10d   :  { %456 = vst [vmem:[%s1072_s3 + $0xe0] sm:$0xff] %v322_v44  ;;  %488 = vst [vmem:[%s1072_s3 + $0x1e0] sm:$0xff] %v418_v45  ;;  %v324_v48 = vadd.f32 %v323_v46, %v779_v55  ;;  %v420_v49 = vadd.f32 %v419_v47, %v779_v55 }
 0x10e   :  { %v327_v50 = vpop.f32.mrf.mxu0  ;;  %v423_v51 = vpop.f32.mrf.mxu1 }
 0x10f   :  { %457 = vst.msk [vmem:[%s1072_s3 + $0xe8] sm:$0xff] %vm74_vm0, %v324_v48  ;;  %489 = vst.msk [vmem:[%s1072_s3 + $0x1e8] sm:$0xff] %vm74_vm0, %v420_v49  ;;  %v328_v52 = vadd.f32 %v327_v50, %v777_v54  ;;  %v424_v53 = vadd.f32 %v423_v51, %v777_v54 }
 0x110   :  { %v329_v56 = vpop.f32.mrf.mxu0  ;;  %v425_v57 = vpop.f32.mrf.mxu1 }
 0x111   :  { %458 = vst [vmem:[%s1072_s3 + $0xf0] sm:$0xff] %v328_v52  ;;  %490 = vst [vmem:[%s1072_s3 + $0x1f0] sm:$0xff] %v424_v53  ;;  %v330_v58 = vadd.f32 %v329_v56, %v779_v55  ;;  %v426_v59 = vadd.f32 %v425_v57, %v779_v55 }
 0x113   :  { %459 = vst.msk [vmem:[%s1072_s3 + $0xf8] sm:$0xff] %vm74_vm0, %v330_v58  ;;  %491 = vst.msk [vmem:[%s1072_s3 + $0x1f8] sm:$0xff] %vm74_vm0, %v426_v59 }

</bundles_post_ra>
